<compile_context>
chip_gen: v7x
topology: tpu7x:2x2x1
jax: 0.10.0
libtpu: 0.0.40
codegen_flags: <defaults>
</compile_context>

<pallas_src>
import math

import jax
import jax.numpy as jnp
from jax.experimental import pallas as pl
from jax.experimental.pallas import tpu as pltpu


def _num_tensorcores():
    """Best-effort TensorCore-per-chip count (2 on v7x, else 1)."""
    try:
        kind = jax.devices()[0].device_kind.lower()
        if "v7" in kind or "7x" in kind:
            return 2
    except Exception:
        pass
    return 1


def _strategy_attention_kernel(
    # per-block (batched) tensors
    slab_ref,    # (bb, Ne+2*Nb, L) bf16: rows [ems feats | box feats | prec_norm]
    biasm_ref,   # (bb, Ne, Nb+1)   f32 : [:, :, :Nb]=score bias, [:, :, Nb]=ems_mask
    # packed parameters (shared across grid, constant block index -> DMA'd once)
    w_in_ref,    # (Dbox+Dems, H)   bf16: [[w_box],[w_ems]]
    w_attn_ref,  # (H, 4H)          bf16: [w_q*scale | w_k | w_v | w_o]
    b_ref,       # (Ne+Nb+4, H)     f32 : [b_ems x Ne; b_box x Nb; b_q*scale; b_k; b_v; b_o]
    # output
    out_ref,     # (bb, Ne, H)      f32
):
    f32 = jnp.float32
    bf16 = jnp.bfloat16

    bb, Ne, H = out_ref.shape
    Nb = biasm_ref.shape[2] - 1
    Din = w_in_ref.shape[0]
    Nf = Ne + Nb                         # feature rows in the packed slab

    b_all = b_ref[...]                   # (Nf+4, H) f32
    b_enc = b_all[:Nf]                   # per-row encoder bias (ems rows, then box rows)
    b_q = b_all[Nf:Nf + 1]               # 1/sqrt(H) already folded in
    b_k = b_all[Nf + 1:Nf + 2]
    b_v = b_all[Nf + 2:Nf + 3]
    b_o = b_all[Nf + 3:Nf + 4]

    w_attn = w_attn_ref[...]             # (H, 4H) bf16
    w_qkv = w_attn[:, :3 * H]
    w_o = w_attn[:, 3 * H:]

    biasm = biasm_ref[...]               # (bb, Ne, Nb+1) f32
    score_bias = biasm[:, :, :Nb]        # additive mask (0 / -1e9)
    ems_mask = biasm[:, :, Nb:Nb + 1]    # (bb, Ne, 1) query-validity mask

    # ---- fused ObjectEncoder / SpaceEncoder linear + ReLU (one matmul) ----
    feat = slab_ref[:, :Nf, :Din]                          # (bb, Nf, Din) bf16
    prec = slab_ref[:, Nf:, :Nb]                           # (bb, Nb, Nb)  bf16, row-normalized
    enc = jnp.dot(feat.reshape(bb * Nf, Din), w_in_ref[...],
                  preferred_element_type=f32)
    rel = jnp.maximum(enc.reshape(bb, Nf, H) + b_enc, 0.0)  # (bb, Nf, H) f32
    ems_vecs = rel[:, :Ne]                                 # (bb, Ne, H)
    box_emb = rel[:, Ne:]                                  # (bb, Nb, H)

    # precedence aggregation (degree normalization pre-folded wrapper-side)
    agg = jnp.einsum("bij,bjh->bih", prec, box_emb.astype(bf16),
                     preferred_element_type=f32)
    box_vecs = box_emb + agg                               # (bb, Nb, H) f32

    # ---- fused Q / K / V projection: one (bb*(Ne+Nb), H) @ (H, 3H) matmul ----
    qkv_in = jnp.concatenate([ems_vecs, box_vecs], axis=1).astype(bf16)
    qkv = jnp.dot(qkv_in.reshape(bb * Nf, H), w_qkv,
                  preferred_element_type=f32).reshape(bb, Nf, 3 * H)
    q = (qkv[:, :Ne, 0:H] + b_q).astype(bf16)              # (bb, Ne, H)
    k = (qkv[:, Ne:, H:2 * H] + b_k).astype(bf16)          # (bb, Nb, H)
    v = (qkv[:, Ne:, 2 * H:3 * H] + b_v).astype(bf16)      # (bb, Nb, H)

    # ---- masked single-head cross-attention (softmax kept in f32) ----
    scores = jnp.einsum("bqh,bkh->bqk", q, k,
                        preferred_element_type=f32) + score_bias  # (bb, Ne, Nb)
    m = jnp.max(scores, axis=-1, keepdims=True)
    p = jnp.exp(scores - m)
    denom = jnp.sum(p, axis=-1, keepdims=True) + 1e-9
    p = p * pl.reciprocal(denom, approx=True)

    attn = jnp.einsum("bqk,bkh->bqh", p.astype(bf16), v,
                      preferred_element_type=f32)           # (bb, Ne, H)
    out = jnp.dot(attn.reshape(bb * Ne, H).astype(bf16), w_o,
                  preferred_element_type=f32) + b_o
    out = out.reshape(bb, Ne, H) + ems_vecs                 # residual
    out_ref[...] = (out * ems_mask).astype(out_ref.dtype)   # zero invalid queries


def strategy_attention(box, precedences, ems, ems_mask, ems_to_box_mask, params,
                       box_valid_mask=None, batch_block=32):
    """Fused StrategyAttention forward.  Returns attn_vecs (B, N_ems, H)."""
    f32, bf16 = jnp.float32, jnp.bfloat16
    B, Nb, Dbox = box.shape
    _, Ne, Dems = ems.shape
    H = params["w_q"].shape[0]
    Din = Dbox + Dems
    L = max(Din, Nb)
    Nf = Ne + Nb

    if box_valid_mask is None:
        box_valid_mask = jnp.ones((B, Nb), dtype=f32)
    if precedences is None:
        precedences = jnp.zeros((B, Nb, Nb), dtype=f32)

    # ---------- pack parameters ----------
    scale = 1.0 / math.sqrt(H)

    def row(x):
        return jnp.reshape(x, (1, H)).astype(f32)

    w_in = jnp.concatenate([params["w_box"].astype(f32),
                            params["w_ems"].astype(f32)], axis=0).astype(bf16)   # (Din, H)
    w_attn = jnp.concatenate(
        [params["w_q"].astype(f32) * scale, params["w_k"].astype(f32),
         params["w_v"].astype(f32), params["w_o"].astype(f32)],
        axis=1).astype(bf16)                                                      # (H, 4H)
    b_enc = jnp.concatenate([jnp.tile(row(params["b_ems"]), (Ne, 1)),
                             jnp.tile(row(params["b_box"]), (Nb, 1))], axis=0)    # (Nf, H)
    b_pack = jnp.concatenate(
        [b_enc, row(params["b_q"]) * scale, row(params["b_k"]),
         row(params["b_v"]), row(params["b_o"])], axis=0)                         # (Nf+4, H)

    # ---------- pack per-batch inputs into 2 slabs ----------
    prec = precedences.astype(f32)
    prec_norm = prec / (jnp.sum(prec, axis=-1, keepdims=True) + 1.0)              # pre-normalized

    ems_rows = jnp.pad(ems.astype(f32), ((0, 0), (0, 0), (Dbox, L - Din)))
    box_rows = jnp.pad(box.astype(f32), ((0, 0), (0, 0), (0, L - Dbox)))
    prec_rows = jnp.pad(prec_norm, ((0, 0), (0, 0), (0, L - Nb)))
    slab = jnp.concatenate([ems_rows, box_rows, prec_rows], axis=1).astype(bf16)  # (B, Nf+Nb, L)

    valid = ems_to_box_mask.astype(f32) * box_valid_mask.astype(f32)[:, None, :]
    score_bias = jnp.where(valid > 0.0, 0.0, -1e9).astype(f32)                    # (B, Ne, Nb)
    biasm = jnp.concatenate([score_bias,
                             ems_mask.astype(f32)[..., None]], axis=-1)           # (B, Ne, Nb+1)

    # ---------- batch blocking ----------
    ntc = _num_tensorcores()
    bb = max(1, min(batch_block, B))
    if ntc >= 2 and B > 1:
        # keep >= 2 grid steps so the "parallel" axis shards across v7x's 2 TCs
        bb = min(bb, -(-B // 2))
    n_blk = -(-B // bb)
    B_pad = bb * n_blk
    pad = B_pad - B

    def padb(x):
        if pad == 0:
            return x
        return jnp.pad(x, ((0, pad),) + ((0, 0),) * (x.ndim - 1))

    slab_p = padb(slab)
    biasm_p = padb(biasm)   # padded batches get ems_mask == 0 -> zero output

    def batched(shape):
        nd = len(shape)
        return pl.BlockSpec((bb,) + tuple(shape[1:]),
                            lambda i, nd=nd: (i,) + (0,) * (nd - 1))

    def shared(shape):
        nd = len(shape)
        return pl.BlockSpec(tuple(shape), lambda i, nd=nd: (0,) * nd)

    in_specs = [
        batched(slab_p.shape), batched(biasm_p.shape),
        shared(w_in.shape), shared(w_attn.shape), shared(b_pack.shape),
    ]
    out_spec = pl.BlockSpec((bb, Ne, H), lambda i: (i, 0, 0))

    out = pl.pallas_call(
        _strategy_attention_kernel,
        out_shape=jax.ShapeDtypeStruct((B_pad, Ne, H), f32),
        grid_spec=pltpu.PrefetchScalarGridSpec(
            num_scalar_prefetch=0,
            grid=(n_blk,),
            in_specs=in_specs,
            out_specs=out_spec,
        ),
        compiler_params=pltpu.CompilerParams(
            dimension_semantics=("parallel",)),
    )(slab_p, biasm_p, w_in, w_attn, b_pack)

    return out[:B]


def strategy_attention_ref(box, precedences, ems, ems_mask, ems_to_box_mask,
                           params, box_valid_mask):
    """Pure-JAX f32 reference (same assumed module semantics)."""
    f32 = jnp.float32
    H = params["w_q"].shape[0]
    box_emb = jax.nn.relu(box @ params["w_box"] + params["b_box"])
    prec = precedences.astype(f32)
    deg = jnp.sum(prec, axis=-1, keepdims=True) + 1.0
    agg = jnp.einsum("bij,bjh->bih", prec, box_emb) / deg
    box_vecs = box_emb + agg
    ems_vecs = jax.nn.relu(ems @ params["w_ems"] + params["b_ems"])
    q = ems_vecs @ params["w_q"] + params["b_q"]
    k = box_vecs @ params["w_k"] + params["b_k"]
    v = box_vecs @ params["w_v"] + params["b_v"]
    scores = jnp.einsum("bqh,bkh->bqk", q, k) / jnp.sqrt(jnp.float32(H))
    valid = ems_to_box_mask * box_valid_mask[:, None, :]
    scores = jnp.where(valid > 0.0, scores, -1e9)
    p = jax.nn.softmax(scores, axis=-1)
    attn = jnp.einsum("bqk,bkh->bqh", p, v)
    out = attn @ params["w_o"] + params["b_o"] + ems_vecs
    return out * ems_mask[..., None]


def init_params(key, box_dim, ems_dim, hidden_dim):
    """Deterministic parameter init (Xavier-ish)."""
    ks = jax.random.split(key, 6)

    def lin(k, d_in, d_out):
        s = 1.0 / math.sqrt(d_in)
        w = jax.random.uniform(k, (d_in, d_out), jnp.float32, -s, s)
        b = jnp.zeros((1, d_out), jnp.float32)
        return w, b

    w_box, b_box = lin(ks[0], box_dim, hidden_dim)
    w_ems, b_ems = lin(ks[1], ems_dim, hidden_dim)
    w_q, b_q = lin(ks[2], hidden_dim, hidden_dim)
    w_k, b_k = lin(ks[3], hidden_dim, hidden_dim)
    w_v, b_v = lin(ks[4], hidden_dim, hidden_dim)
    w_o, b_o = lin(ks[5], hidden_dim, hidden_dim)
    return dict(w_box=w_box, b_box=b_box, w_ems=w_ems, b_ems=b_ems,
                w_q=w_q, b_q=b_q, w_k=w_k, b_k=b_k,
                w_v=w_v, b_v=b_v, w_o=w_o, b_o=b_o)


if __name__ == "__main__":
    # Small, module-consistent shapes.
    B = 2            # batch
    N_BOX = 8        # number of boxes
    N_EMS = 8        # number of empty maximal spaces
    BOX_DIM = 6      # box feature dim
    EMS_DIM = 6      # ems feature dim
    HIDDEN = 32      # hidden_dim
    CORNER_NUM = 1   # stored by Encoder; unused in this forward path

    key = jax.random.PRNGKey(0)
    k_box, k_prec, k_ems, k_em, k_bm, k_e2b, k_param = jax.random.split(key, 7)

    box = jax.random.normal(k_box, (B, N_BOX, BOX_DIM), jnp.float32)
    precedences = jax.random.bernoulli(k_prec, 0.3, (B, N_BOX, N_BOX)).astype(jnp.float32)
    ems = jax.random.normal(k_ems, (B, N_EMS, EMS_DIM), jnp.float32)
    ems_mask = jax.random.bernoulli(k_em, 0.8, (B, N_EMS)).astype(jnp.float32)
    box_valid_mask = jax.random.bernoulli(k_bm, 0.8, (B, N_BOX)).astype(jnp.float32)
    # guarantee at least one valid box per (batch, ems) row so softmax is well-posed
    ems_to_box_mask = jax.random.bernoulli(k_e2b, 0.7, (B, N_EMS, N_BOX)).astype(jnp.float32)
    ems_to_box_mask = ems_to_box_mask.at[..., 0].set(1.0)
    box_valid_mask = box_valid_mask.at[..., 0].set(1.0)

    params = init_params(k_param, BOX_DIM, EMS_DIM, HIDDEN)

    attn_vecs = strategy_attention(box, precedences, ems, ems_mask,
                                   ems_to_box_mask, params,
                                   box_valid_mask=box_valid_mask)
    attn_vecs = jax.block_until_ready(attn_vecs)

    ref = strategy_attention_ref(box, precedences, ems, ems_mask,
                                 ems_to_box_mask, params, box_valid_mask)

    assert attn_vecs.shape == (B, N_EMS, HIDDEN)
    assert jnp.all(jnp.isfinite(attn_vecs))
    # bf16 matmuls + approx reciprocal -> loose tolerance vs the f32 reference
    max_err = float(jnp.max(jnp.abs(attn_vecs - ref)))
    assert max_err < 0.3, f"max abs err vs reference: {max_err}"
    print("KERNEL_OK")
</pallas_src>

<mosaic_0001>
module attributes {stable_mosaic.version = 11 : i64} {
  func.func @_strategy_attention_kernel(%arg0: i32, %arg1: memref<2x24x12xbf16, #tpu.memory_space<vmem>>, %arg2: memref<2x8x9xf32, #tpu.memory_space<vmem>>, %arg3: memref<12x32xbf16, #tpu.memory_space<vmem>>, %arg4: memref<32x128xbf16, #tpu.memory_space<vmem>>, %arg5: memref<20x32xf32, #tpu.memory_space<vmem>>, %arg6: memref<2x8x32xf32, #tpu.memory_space<vmem>>) attributes {dimension_semantics = [#tpu.dimension_semantics<parallel>], iteration_bounds = array<i64: 1>, scalar_prefetch = 0 : i64, scratch_operands = 0 : i64, tpu.core_type = #tpu.core_type<tc>, window_params = [{transform_indices = @transform_0, window_bounds = array<i64: 2, 24, 12>}, {transform_indices = @transform_1, window_bounds = array<i64: 2, 8, 9>}, {pipeline_mode = #tpu.pipeline_mode<synchronous>, transform_indices = @transform_2, window_bounds = array<i64: 12, 32>}, {pipeline_mode = #tpu.pipeline_mode<synchronous>, transform_indices = @transform_3, window_bounds = array<i64: 32, 128>}, {pipeline_mode = #tpu.pipeline_mode<synchronous>, transform_indices = @transform_4, window_bounds = array<i64: 20, 32>}, {transform_indices = @transform_5, window_bounds = array<i64: 2, 8, 32>}]} {
    %c0 = arith.constant 0 : index
    %c0_0 = arith.constant 0 : index
    %0 = vector.load %arg5[%c0, %c0_0] : memref<20x32xf32, #tpu.memory_space<vmem>>, vector<20x32xf32>
    %1 = vector.extract_strided_slice %0 {offsets = [0, 0], sizes = [16, 32], strides = [1, 1]} : vector<20x32xf32> to vector<16x32xf32>
    %2 = vector.extract_strided_slice %0 {offsets = [16, 0], sizes = [1, 32], strides = [1, 1]} : vector<20x32xf32> to vector<1x32xf32>
    %3 = vector.extract_strided_slice %0 {offsets = [17, 0], sizes = [1, 32], strides = [1, 1]} : vector<20x32xf32> to vector<1x32xf32>
    %4 = vector.extract_strided_slice %0 {offsets = [18, 0], sizes = [1, 32], strides = [1, 1]} : vector<20x32xf32> to vector<1x32xf32>
    %5 = vector.extract_strided_slice %0 {offsets = [19, 0], sizes = [1, 32], strides = [1, 1]} : vector<20x32xf32> to vector<1x32xf32>
    %c0_1 = arith.constant 0 : index
    %c0_2 = arith.constant 0 : index
    %6 = vector.load %arg4[%c0_1, %c0_2] : memref<32x128xbf16, #tpu.memory_space<vmem>>, vector<32x128xbf16>
    %7 = vector.extract_strided_slice %6 {offsets = [0, 0], sizes = [32, 96], strides = [1, 1]} : vector<32x128xbf16> to vector<32x96xbf16>
    %8 = vector.extract_strided_slice %6 {offsets = [0, 96], sizes = [32, 32], strides = [1, 1]} : vector<32x128xbf16> to vector<32x32xbf16>
    %c0_3 = arith.constant 0 : index
    %c0_4 = arith.constant 0 : index
    %c0_5 = arith.constant 0 : index
    %9 = vector.load %arg2[%c0_3, %c0_4, %c0_5] : memref<2x8x9xf32, #tpu.memory_space<vmem>>, vector<2x8x9xf32>
    %10 = vector.extract_strided_slice %9 {offsets = [0, 0, 0], sizes = [2, 8, 8], strides = [1, 1, 1]} : vector<2x8x9xf32> to vector<2x8x8xf32>
    %11 = vector.extract_strided_slice %9 {offsets = [0, 0, 8], sizes = [2, 8, 1], strides = [1, 1, 1]} : vector<2x8x9xf32> to vector<2x8x1xf32>
    %c0_6 = arith.constant 0 : index
    %c0_7 = arith.constant 0 : index
    %c0_8 = arith.constant 0 : index
    %12 = vector.load %arg1[%c0_6, %c0_7, %c0_8] : memref<2x24x12xbf16, #tpu.memory_space<vmem>>, vector<2x16x12xbf16>
    %c0_9 = arith.constant 0 : index
    %c16 = arith.constant 16 : index
    %c0_10 = arith.constant 0 : index
    %13 = vector.load %arg1[%c0_9, %c16, %c0_10] : memref<2x24x12xbf16, #tpu.memory_space<vmem>>, vector<2x8x8xbf16>
    %14 = vector.shape_cast %12 : vector<2x16x12xbf16> to vector<32x12xbf16>
    %c0_11 = arith.constant 0 : index
    %c0_12 = arith.constant 0 : index
    %15 = vector.load %arg3[%c0_11, %c0_12] : memref<12x32xbf16, #tpu.memory_space<vmem>>, vector<12x32xbf16>
    %cst = arith.constant dense<0.000000e+00> : vector<32x32xf32>
    %16 = tpu.matmul %14, %15, %cst {dimension_numbers = #tpu.dot_dimension_numbers<[1], [0], [0], [1], [0, 0, 1, 1], [], []>} : vector<32x12xbf16>, vector<12x32xbf16>, vector<32x32xf32> -> vector<32x32xf32>
    %17 = vector.shape_cast %16 : vector<32x32xf32> to vector<2x16x32xf32>
    %18 = vector.shape_cast %1 : vector<16x32xf32> to vector<1x16x32xf32>
    %19 = vector.broadcast %18 : vector<1x16x32xf32> to vector<2x16x32xf32>
    %20 = arith.addf %17, %19 : vector<2x16x32xf32>
    %cst_13 = arith.constant 0.000000e+00 : f32
    %21 = vector.broadcast %cst_13 : f32 to vector<2x16x32xf32>
    %22 = arith.maximumf %20, %21 : vector<2x16x32xf32>
    %23 = vector.extract_strided_slice %22 {offsets = [0, 0, 0], sizes = [2, 8, 32], strides = [1, 1, 1]} : vector<2x16x32xf32> to vector<2x8x32xf32>
    %24 = vector.extract_strided_slice %22 {offsets = [0, 8, 0], sizes = [2, 8, 32], strides = [1, 1, 1]} : vector<2x16x32xf32> to vector<2x8x32xf32>
    %25 = arith.truncf %24 : vector<2x8x32xf32> to vector<2x8x32xbf16>
    "tpu.trace_start"() <{level = 10 : i32, message = "bij,bjh->bih"}> : () -> ()
    %cst_14 = arith.constant dense<0.000000e+00> : vector<2x8x32xf32>
    %26 = tpu.matmul %13, %25, %cst_14 {dimension_numbers = #tpu.dot_dimension_numbers<[2], [1], [1], [2], [0, 0, 0, 1, 1, 2], [0], [0]>} : vector<2x8x8xbf16>, vector<2x8x32xbf16>, vector<2x8x32xf32> -> vector<2x8x32xf32>
    "tpu.trace_stop"() : () -> ()
    %27 = arith.addf %24, %26 : vector<2x8x32xf32>
    %28 = tpu.concatenate %23, %27 in 1 : vector<2x8x32xf32>, vector<2x8x32xf32> -> vector<2x16x32xf32>
    %29 = arith.truncf %28 : vector<2x16x32xf32> to vector<2x16x32xbf16>
    %30 = vector.shape_cast %29 : vector<2x16x32xbf16> to vector<32x32xbf16>
    %cst_15 = arith.constant dense<0.000000e+00> : vector<32x96xf32>
    %31 = tpu.matmul %30, %7, %cst_15 {dimension_numbers = #tpu.dot_dimension_numbers<[1], [0], [0], [1], [0, 0, 1, 1], [], []>} : vector<32x32xbf16>, vector<32x96xbf16>, vector<32x96xf32> -> vector<32x96xf32>
    %32 = vector.shape_cast %31 : vector<32x96xf32> to vector<2x16x96xf32>
    %33 = vector.extract_strided_slice %32 {offsets = [0, 0, 0], sizes = [2, 8, 32], strides = [1, 1, 1]} : vector<2x16x96xf32> to vector<2x8x32xf32>
    %34 = vector.shape_cast %2 : vector<1x32xf32> to vector<1x1x32xf32>
    %35 = vector.broadcast %34 : vector<1x1x32xf32> to vector<2x8x32xf32>
    %36 = arith.addf %33, %35 : vector<2x8x32xf32>
    %37 = arith.truncf %36 : vector<2x8x32xf32> to vector<2x8x32xbf16>
    %38 = vector.extract_strided_slice %32 {offsets = [0, 8, 32], sizes = [2, 8, 32], strides = [1, 1, 1]} : vector<2x16x96xf32> to vector<2x8x32xf32>
    %39 = vector.shape_cast %3 : vector<1x32xf32> to vector<1x1x32xf32>
    %40 = vector.broadcast %39 : vector<1x1x32xf32> to vector<2x8x32xf32>
    %41 = arith.addf %38, %40 : vector<2x8x32xf32>
    %42 = arith.truncf %41 : vector<2x8x32xf32> to vector<2x8x32xbf16>
    %43 = vector.extract_strided_slice %32 {offsets = [0, 8, 64], sizes = [2, 8, 32], strides = [1, 1, 1]} : vector<2x16x96xf32> to vector<2x8x32xf32>
    %44 = vector.shape_cast %4 : vector<1x32xf32> to vector<1x1x32xf32>
    %45 = vector.broadcast %44 : vector<1x1x32xf32> to vector<2x8x32xf32>
    %46 = arith.addf %43, %45 : vector<2x8x32xf32>
    %47 = arith.truncf %46 : vector<2x8x32xf32> to vector<2x8x32xbf16>
    "tpu.trace_start"() <{level = 10 : i32, message = "bqh,bkh->bqk"}> : () -> ()
    %cst_16 = arith.constant dense<0.000000e+00> : vector<2x8x8xf32>
    %48 = tpu.matmul %37, %42, %cst_16 {dimension_numbers = #tpu.dot_dimension_numbers<[2], [2], [1], [1], [0, 0, 0, 1, 1, 1], [0], [0]>} : vector<2x8x32xbf16>, vector<2x8x32xbf16>, vector<2x8x8xf32> -> vector<2x8x8xf32>
    "tpu.trace_stop"() : () -> ()
    %49 = arith.addf %48, %10 : vector<2x8x8xf32>
    %cst_17 = arith.constant dense<0xFF800000> : vector<2x8xf32>
    %50 = vector.multi_reduction <maximumf>, %49, %cst_17 [2] : vector<2x8x8xf32> to vector<2x8xf32>
    %51 = vector.shape_cast %50 : vector<2x8xf32> to vector<2x8x1xf32>
    %52 = vector.broadcast %51 : vector<2x8x1xf32> to vector<2x8x8xf32>
    %53 = arith.subf %49, %52 : vector<2x8x8xf32>
    %54 = math.exp %53 : vector<2x8x8xf32>
    %cst_18 = arith.constant dense<0.000000e+00> : vector<2x8xf32>
    %55 = vector.multi_reduction <add>, %54, %cst_18 [2] : vector<2x8x8xf32> to vector<2x8xf32>
    %56 = vector.shape_cast %55 : vector<2x8xf32> to vector<2x8x1xf32>
    %cst_19 = arith.constant 9.99999971E-10 : f32
    %57 = vector.broadcast %cst_19 : f32 to vector<2x8x1xf32>
    %58 = arith.addf %56, %57 : vector<2x8x1xf32>
    %59 = tpu.reciprocal %58 {approx = true} : vector<2x8x1xf32> -> vector<2x8x1xf32>
    %60 = vector.broadcast %59 : vector<2x8x1xf32> to vector<2x8x8xf32>
    %61 = arith.mulf %54, %60 : vector<2x8x8xf32>
    %62 = arith.truncf %61 : vector<2x8x8xf32> to vector<2x8x8xbf16>
    "tpu.trace_start"() <{level = 10 : i32, message = "bqk,bkh->bqh"}> : () -> ()
    %cst_20 = arith.constant dense<0.000000e+00> : vector<2x8x32xf32>
    %63 = tpu.matmul %62, %47, %cst_20 {dimension_numbers = #tpu.dot_dimension_numbers<[2], [1], [1], [2], [0, 0, 0, 1, 1, 2], [0], [0]>} : vector<2x8x8xbf16>, vector<2x8x32xbf16>, vector<2x8x32xf32> -> vector<2x8x32xf32>
    "tpu.trace_stop"() : () -> ()
    %64 = vector.shape_cast %63 : vector<2x8x32xf32> to vector<16x32xf32>
    %65 = arith.truncf %64 : vector<16x32xf32> to vector<16x32xbf16>
    %cst_21 = arith.constant dense<0.000000e+00> : vector<16x32xf32>
    %66 = tpu.matmul %65, %8, %cst_21 {dimension_numbers = #tpu.dot_dimension_numbers<[1], [0], [0], [1], [0, 0, 1, 1], [], []>} : vector<16x32xbf16>, vector<32x32xbf16>, vector<16x32xf32> -> vector<16x32xf32>
    %67 = vector.broadcast %5 : vector<1x32xf32> to vector<16x32xf32>
    %68 = arith.addf %66, %67 : vector<16x32xf32>
    %69 = vector.shape_cast %68 : vector<16x32xf32> to vector<2x8x32xf32>
    %70 = arith.addf %69, %23 : vector<2x8x32xf32>
    %71 = vector.broadcast %11 : vector<2x8x1xf32> to vector<2x8x32xf32>
    %72 = arith.mulf %70, %71 : vector<2x8x32xf32>
    %c0_22 = arith.constant 0 : index
    %c0_23 = arith.constant 0 : index
    %c0_24 = arith.constant 0 : index
    %73 = vector.load %arg6[%c0_22, %c0_23, %c0_24] : memref<2x8x32xf32, #tpu.memory_space<vmem>>, vector<2x8x32xf32>
    tpu.vector_store %arg6[%c0_22, %c0_23, %c0_24], %72 {strides = array<i32>} : memref<2x8x32xf32, #tpu.memory_space<vmem>>, vector<2x8x32xf32>,
    return
  }
  func.func @transform_0(%arg0: i32) -> (i32, i32, i32) {
    %c0_i32 = arith.constant 0 : i32
    %c0_i32_0 = arith.constant 0 : i32
    %c0_i32_1 = arith.constant 0 : i32
    return %arg0, %c0_i32, %c0_i32_0 : i32, i32, i32
  }
  func.func @transform_1(%arg0: i32) -> (i32, i32, i32) {
    %c0_i32 = arith.constant 0 : i32
    %c0_i32_0 = arith.constant 0 : i32
    %c0_i32_1 = arith.constant 0 : i32
    return %arg0, %c0_i32, %c0_i32_0 : i32, i32, i32
  }
  func.func @transform_2(%arg0: i32) -> (i32, i32) {
    %c0_i32 = arith.constant 0 : i32
    %c0_i32_0 = arith.constant 0 : i32
    %c0_i32_1 = arith.constant 0 : i32
    return %c0_i32, %c0_i32_0 : i32, i32
  }
  func.func @transform_3(%arg0: i32) -> (i32, i32) {
    %c0_i32 = arith.constant 0 : i32
    %c0_i32_0 = arith.constant 0 : i32
    %c0_i32_1 = arith.constant 0 : i32
    return %c0_i32, %c0_i32_0 : i32, i32
  }
  func.func @transform_4(%arg0: i32) -> (i32, i32) {
    %c0_i32 = arith.constant 0 : i32
    %c0_i32_0 = arith.constant 0 : i32
    %c0_i32_1 = arith.constant 0 : i32
    return %c0_i32, %c0_i32_0 : i32, i32
  }
  func.func @transform_5(%arg0: i32) -> (i32, i32, i32) {
    %c0_i32 = arith.constant 0 : i32
    %c0_i32_0 = arith.constant 0 : i32
    %c0_i32_1 = arith.constant 0 : i32
    return %arg0, %c0_i32, %c0_i32_0 : i32, i32, i32
  }
}

</mosaic_0001>

<bundles_post_ra>
// kernel: tpu_custom_call.1
= control target key start
LH: loop header
LB: loop body
LE: loop exit
PB: predicated region body
PF: predicated region fallthrough
CT: control target
= control target key end

     0   :  { %10 = vsyncpa [#allocation3], 0  ;;  %s1063_s0 = inlined_call_operand.vmem [shape: bf16[2,24,12], index: 0, kind: input, shape index: {}]   ;;  %s1064_s1 = inlined_call_operand.vmem [shape: f32[2,8,9], index: 1, kind: input, shape index: {}]   ;;  %s1065_s2 = inlined_call_operand.hbm [shape: bf16[12,32], index: 2, kind: input, shape index: {}]   ;;  %s1066_s3 = inlined_call_operand.hbm [shape: bf16[32,128], index: 3, kind: input, shape index: {}]   ;;  %s1067_s4 = inlined_call_operand.vmem [shape: f32[20,32], index: 4, kind: input, shape index: {}]   ;;  %s1068_s5 = inlined_call_operand.hbm [shape: f32[2,8,32], index: 5, kind: output, shape index: {}]  }
   0x1   :  { %11 = vsyncpa [#allocation6], 0 }
   0x2   :  { %12 = vsyncpa [#allocation4], 0  ;;  %s857_s18 = smov [#allocation2]   ;;  %s785_s22 = scalar_lea.hbm %s1065_s2, 128 }
   0x3   :  { %s22_s19 = sshll.u32 %s857_s18, 4  ;;  %p786_p0 = scmp.ne.s32.totalorder %s1065_s2, %s785_s22  ;;  %s23_s19 = int_to_ptr.vmem [resolvable:$true] %s22_s19 }
   0x4   :  { %p789_p1 = scmp.lt.u32.totalorder %s785_s22, %s1065_s2 }
   0x6   :  { %p791_p2 = pnand %p789_p1, %p786_p0 }
   0x8   :  { %794 = shalt.err (!%p791_p2)
}
   0x9   :  { %s795_s27 = scalar_lea.vmem %s23_s19, 128  ;;  %p800_p4 = scmp.lt.s32.totalorder %s23_s19, %s23_s19 }
   0xa   :  { %p796_p3 = scmp.ne.s32.totalorder %s23_s19, %s795_s27  ;;  %p801_p5 = scmp.lt.s32.totalorder %s795_s27, %s795_s27 }
   0xc   :  { %p802_p6 = por %p801_p5, %p800_p4 }
   0xe   :  { %p803_p7 = pnand %p802_p6, %p796_p3 }
  0x10   :  { %806 = shalt.err (!%p803_p7)
}
  0x11   :  { %s858_s28 = smov 64   ;;  %s859_s29 = smov 4  }
  0x12   :  { %28 = dma.hbm_to_vmem [thread:$0]  %s1065_s2, 128, %s23_s19, [#allocation3], %s858_s28, %s858_s28, %s859_s29  }
  0x13   :  { %s860_s7 = smov [#allocation5]   ;;  %s807_s11 = scalar_lea.hbm %s1066_s3, 256 }
  0x14   :  { %s34_s8 = sshll.u32 %s860_s7, 4  ;;  %p808_p8 = scmp.ne.s32.totalorder %s1066_s3, %s807_s11  ;;  %s35_s8 = int_to_ptr.vmem [resolvable:$true] %s34_s8 }
  0x15   :  { %p811_p9 = scmp.lt.u32.totalorder %s807_s11, %s1066_s3 }
  0x17   :  { %p813_p10 = pnand %p811_p9, %p808_p8 }
  0x19   :  { %816 = shalt.err (!%p813_p10)
}
  0x1a   :  { %s817_s16 = scalar_lea.vmem %s35_s8, 256  ;;  %p822_p12 = scmp.lt.s32.totalorder %s35_s8, %s35_s8 }
  0x1b   :  { %p818_p11 = scmp.ne.s32.totalorder %s35_s8, %s817_s16  ;;  %p823_p13 = scmp.lt.s32.totalorder %s817_s16, %s817_s16 }
  0x1d   :  { %p824_p0 = por %p823_p13, %p822_p12 }
  0x1f   :  { %p825_p1 = pnand %p824_p0, %p818_p11 }
  0x21   :  { %828 = shalt.err (!%p825_p1)
}
  0x22   :  { %40 = dma.hbm_to_vmem [thread:$0]  %s1066_s3, 256, %s35_s8, [#allocation6], %s858_s28, %s858_s28, %s859_s29  }
  0x23   :  { %851 = dma.done.wait [#allocation3], 128  }
  0x24   :  { %852 = vsyncadd [#allocation3], 4294967168 }
  0x25   :  { %853 = dma.done.wait [#allocation6], 256  }
  0x26   :  { %854 = vsyncadd [#allocation6], 4294967040  ;;  %vm89_vm0 = vcmask 1045504   ;;  %vm82_vm1 = vcmask 97280   ;;  %v772_v0 = vld [vmem:[#allocation2] sm:$0x3f]   ;;  %v318_v22 = vlaneseq }
  0x27   :  { %v773_v1 = vld [vmem:[%s1063_s0] sm:$0xff]   ;;  %757 = vmatprep.subr.msk.bf16.mxu0 %vm89_vm0, %v772_v0  ;;  %v91_v2 = vsel %vm89_vm0, %v772_v0, 0  ;;  %v774_v3 = vld [vmem:[%s1063_s0 + $0xc] sm:$0xff]   ;;  %v861_v4 = vmov 0.0   ;;  %vm862_vm2 = vmmov 0   ;;  %vm156_vm3 = vcmask 1043456  }
  0x28   :  { %700 = vmatpush3.bf16.msra.mxu0 %v91_v2  ;;  %701 = vmatprep.mubr.msk.bf16.mxu0 %vm82_vm1, %v773_v1  ;;  %v51_v6 = vld [vmem:[%s1067_s4 + $0x8] sm:$0xff]  ;;  %v942_v16 = vld [vmem:[#allocation5] sm:$0xff]   ;;  %v64_v19 = vld [vmem:[%s1063_s0 + $0x14] sm:$0xf]  ;;  %vm152_vm4 = vcmask 64512   ;;  %v964_v23 = vshrl.u32 %v318_v22, 7 }
  0x29   :  { %711 = vmatprep.subr.bf16.mxu0 %v861_v4  ;;  %705 = vmatprep.subr.bf16.mxu1 %v861_v4  ;;  %v63_v20 = vld [vmem:[%s1063_s0 + $0x8] sm:$0xf]  ;;  %v969_v24 = vld [vmem:[%s1067_s4 + $0x10] sm:$0xf]  ;;  %s863_s29 = smov 32   ;;  %v50_v27 = vld [vmem:[%s1067_s4] sm:$0xff] }
  0x2a   :  { %707 = vmatprep.mubr.msk.bf16.mxu1 %vm862_vm2, %v861_v4  ;;  %v959_v21 = vld [vmem:[#allocation5 + $0x8] sm:$0xff]   ;;  %v328_v25 = vsub.s32 1, %v964_v23  ;;  %vm262_vm5 = vcmask 261120   ;;  %s864_s4 = smov 96   ;;  %v320_v53 = vsub.s32 0, %v964_v23  ;;  %v1014_v0 = vld [vmem:[%s1064_s1] sm:$0xff] }
  0x2b   :  { %702 = vmatmul.mubr.msk.bf16.vlgmr.msra.gmra.mrb[0].mxu0 %vm82_vm1, %v774_v3  ;;  %v1009_v63 = vld [vmem:[%s1064_s1 + $0x8] sm:$0xff]  ;;  %s866_s1 = smov [#allocation7]  }
  0x2c   :  { %713 = vmatprep.mubr.msk.bf16.mxu0 %vm862_vm2, %v861_v4  ;;  %v329_v26 = vrot.slane %v969_v24, %v328_v25  ;;  %v321_v54 = vrot.slane %v969_v24, %v320_v53  ;;  %v865_v53 = vmov 8  }
  0x2d   :  { %770 = vset.pattern.permute.xlu0 %v865_v53  ;;  %771 = vset.pattern.permute.xlu1 %v865_v53 }
  0x2e   :  { %331 = vrot.lane.b32.xlu0 %v329_v26, %s863_s29 }
  0xa0   :  { %v332_v45 = vpop.permute.xlu0 %331 }
  0xfe   :  { %v703_v5 = vpop.f32.mrb[0].mxu0 }
  0xff   :  { %v127_v7 = vpop.f32.mrb[1].mxu0  ;;  %v979_v29 = vadd.f32 %v703_v5, %v50_v27 }
 0x100   :  { %v704_v8 = vpop.f32.mrb[2].mxu0  ;;  %v977_v28 = vadd.f32 %v127_v7, %v50_v27 }
 0x101   :  { %v145_v9 = vadd.f32 %v704_v8, %v51_v6  ;;  %v130_v10 = vpop.f32.mrb[3].mxu0  ;;  %v148_v38 = vmax.f32 %v979_v29, 0.0 }
 0x102   :  { %v143_v11 = vadd.f32 %v130_v10, %v51_v6  ;;  %v146_v34 = vmax.f32 %v977_v28, 0.0 }
 0x103   :  { %v149_v12 = vmax.f32 %v145_v9, 0.0 }
 0x104   :  { %v147_v13 = vmax.f32 %v143_v11, 0.0 }
 0x105   :  { %v151_v14 = vpack.c.bf16 %v149_v12, %v149_v12 }
 0x106   :  { %v150_v15 = vpack.c.bf16 %v147_v13, %v147_v13 }
 0x107   :  { %v204_v17 = vsel %vm156_vm3, %v151_v14, 0  ;;  %v340_v14 = vsub.s32 2, %v964_v23 }
 0x108   :  { %712 = vmatpush3.bf16.msra.mxu0 %v204_v17  ;;  %v158_v18 = vsel %vm156_vm3, %v150_v15, 0 }
 0x109   :  { %706 = vmatpush3.bf16.msra.mxu1 %v158_v18  ;;  %725 = vmatprep.subr.bf16.mxu0 %v861_v4  ;;  %v341_v15 = vrot.slane %v969_v24, %v340_v14 }
 0x10a   :  { %717 = vmatprep.subr.bf16.mxu1 %v942_v16 }
 0x10b   :  { %714 = vmatmul.mubr.msk.bf16.vlgmr.msra.gmra.mrb[4].mxu0 %vm152_vm4, %v64_v19 }
 0x10c   :  { %708 = vmatmul.mubr.msk.bf16.vlgmr.msra.gmra.mrb[0].mxu1 %vm152_vm4, %v63_v20  ;;  %727 = vmatprep.mubr.msk.bf16.mxu0 %vm862_vm2, %v861_v4 }
 0x10d   :  { %718 = vmatpush3.bf16.msra.mxu1 %v942_v16 }
 0x10e   :  { %719 = vmatprep.subr.bf16.mxu1 %v959_v21 }
 0x111   :  { %720 = vmatpush3.bf16.msra.mxu1 %v959_v21 }
 0x112   :  { %731 = vmatprep.subr.bf16.mxu1 %v861_v4 }
 0x1de   :  { %v240_v30 = vpop.f32.mrb[4].mxu0 }
 0x1df   :  { %v247_v31 = vadd.f32 %v240_v30, %v149_v12  ;;  %v194_v32 = vpop.f32.mrb[0].mxu1  ;;  %v715_v33 = vpop.f32.mrb[5].mxu0 }
 0x1e0   :  { %v246_v35 = vadd.f32 %v194_v32, %v147_v13  ;;  %v709_v36 = vpop.f32.mrb[1].mxu1  ;;  %v243_v37 = vpop.f32.mrb[6].mxu0 }
 0x1e1   :  { %v197_v39 = vpop.f32.mrb[2].mxu1  ;;  %v716_v40 = vpop.f32.mrb[7].mxu0  ;;  %v249_v43 = vpack.c.bf16 %v247_v31, %v148_v38 }
 0x1e2   :  { %v248_v41 = vpack.c.bf16 %v246_v35, %v146_v34  ;;  %v710_v42 = vpop.f32.mrb[3].mxu1 }
 0x1e4   :  { %721 = vmatprep.mubr.msk.bf16.mxu1 %vm262_vm5, %v248_v41 }
 0x1e5   :  { %722 = vmatmul.mubr.msk.bf16.vlgmr.msra.gmra.mrb[4].mxu1 %vm262_vm5, %v249_v43 }
 0x1e6   :  { %733 = vmatprep.mubr.msk.bf16.mxu1 %vm862_vm2, %v861_v4 }
 0x2b8   :  { %v723_v44 = vpop.f32.mrb[4].mxu1 }
 0x2b9   :  { %v303_v46 = vpop.f32.mrb[5].mxu1  ;;  %v323_v59 = vadd.f32 %v723_v44, %v321_v54 }
 0x2ba   :  { %v724_v47 = vpop.f32.mrb[6].mxu1  ;;  %v322_v60 = vadd.f32 %v321_v54, %v303_v46 }
 0x2bb   :  { %v335_v48 = vadd.f32 %v724_v47, %v332_v45  ;;  %v991_v49 = vpop.f32.mrb[7].mxu1  ;;  %v325_v61 = vpack.c.bf16 %v323_v59, %v323_v59 }
 0x2bc   :  { %v334_v50 = vadd.f32 %v332_v45, %v991_v49  ;;  %v324_v62 = vpack.c.bf16 %v322_v60, %v322_v60 }
 0x2bd   :  { %v337_v51 = vpack.c.bf16 %v335_v48, %v335_v48 }
 0x2be   :  { %v336_v52 = vpack.c.bf16 %v334_v50, %v334_v50 }
 0x2bf   :  { %400 = vrot.lane.b32.xlu1 %v337_v51, %s864_s4 }
 0x2c0   :  { %351 = vrot.lane.b32.xlu0 %v336_v52, %s864_s4 }
 0x331   :  { %v401_v55 = vpop.permute.xlu1 %400 }
 0x332   :  { %v406_v56 = vsel %vm262_vm5, %v401_v55, 0  ;;  %v352_v57 = vpop.permute.xlu0 %351 }
 0x333   :  { %v357_v58 = vsel %vm262_vm5, %v352_v57, 0  ;;  %732 = vmatpush3.bf16.xpose.msra.mxu1 %v406_v56 }
 0x334   :  { %726 = vmatpush3.bf16.xpose.msra.mxu0 %v357_v58  ;;  %743 = vmatprep.subr.bf16.mxu1 %v861_v4 }
 0x335   :  { %737 = vmatprep.subr.bf16.mxu0 %v861_v4 }
 0x33a   :  { %734 = vmatmul.mubr.msk.bf16.vlgmr.msra.gmra.mrb[8].mxu1 %vm262_vm5, %v325_v61 }
 0x33b   :  { %728 = vmatmul.mubr.msk.bf16.vlgmr.msra.gmra.mrb[8].mxu0 %vm262_vm5, %v324_v62  ;;  %745 = vmatprep.mubr.msk.bf16.mxu1 %vm862_vm2, %v861_v4 }
 0x33c   :  { %739 = vmatprep.mubr.msk.bf16.mxu0 %vm862_vm2, %v861_v4 }
 0x40d   :  { %v442_v1 = vpop.f32.mrb[8].mxu1 }
 0x40e   :  { %v443_v2 = vadd.f32 %v442_v1, %v1009_v63  ;;  %v393_v3 = vpop.f32.mrb[8].mxu0  ;;  %v735_v5 = vpop.f32.mrb[9].mxu1 }
 0x40f   :  { %v394_v6 = vadd.f32 %v393_v3, %v1014_v0  ;;  %v729_v7 = vpop.f32.mrb[9].mxu0  ;;  %v445_v8 = vpop.f32.mrb[10].mxu1 }
 0x410   :  { %v396_v9 = vpop.f32.mrb[10].mxu0  ;;  %v736_v10 = vpop.f32.mrb[11].mxu1  ;;  %v451_v11 = vsel %vm152_vm4, %v443_v2, -inf }
 0x411   :  { %452 = vmax.xlane.f32.xlu0 %v451_v11  ;;  %v730_v12 = vpop.f32.mrb[11].mxu0  ;;  %v448_v13 = vsel %vm152_vm4, %v394_v6, -inf }
 0x412   :  { %449 = vmax.xlane.f32.xlu1 %v448_v13 }
 0x427   :  { %343 = vrot.lane.b32.xlu0 %v341_v15, %s858_s28 }
 0x49e   :  { %v453_v17 = vpop.xlane.xlu0 %452 }
 0x49f   :  { %v455_v18 = vsub.f32 %v443_v2, %v453_v17  ;;  %v450_v19 = vpop.xlane.xlu1 %449 }
 0x4a0   :  { %v454_v20 = vsub.f32 %v394_v6, %v450_v19 }
 0x4a1   :  { %v458_v22 = vmul.f32 1.442695, %v455_v18 }
 0x4a2   :  { %v456_v25 = vmul.f32 1.442695, %v454_v20  ;;  %v344_v26 = vpop.permute.xlu0 %343 }
 0x4a3   :  { %777 = vpow2.f32 %v458_v22  ;;  %v347_v27 = vadd.f32 %v724_v47, %v344_v26  ;;  %v346_v36 = vadd.f32 %v344_v26, %v991_v49 }
 0x4a4   :  { %779 = vpow2.f32 %v456_v25 }
 0x4a5   :  { %v349_v30 = vpack.c.bf16 %v347_v27, %v347_v27  ;;  %v348_v37 = vpack.c.bf16 %v346_v36, %v346_v36 }
 0x4a7   :  { %524 = vrot.lane.b32.xlu0 %v349_v30, %s858_s28 }
 0x4ab   :  { %577 = vrot.lane.b32.xlu0 %v942_v16, %s863_s29 }
 0x4ad   :  { %v778_v31 = vpop.eup %777 }
 0x4ae   :  { %v463_v32 = vsel %vm152_vm4, %v778_v31, 0.0  ;;  %v780_v33 = vpop.eup %779 }
 0x4af   :  { %464 = vadd.xlane.f32.xlu1 %v463_v32  ;;  %v460_v35 = vsel %vm152_vm4, %v780_v33, 0.0  ;;  %631 = vperm.xlu0 %770, %v1014_v0  }
 0x4b3   :  { %461 = vadd.xlane.f32.xlu1 %v460_v35 }
 0x4c4   :  { %475 = vrot.lane.b32.xlu1 %v348_v37, %s858_s28  ;;  %s648_s28 = sshll.u32 %s866_s1, 4  ;;  %s649_s28 = int_to_ptr.vmem [resolvable:$true] %s648_s28 }
 0x4c5   :  { %s829_s11 = scalar_lea.vmem %s649_s28, 256  ;;  %p834_p3 = scmp.lt.s32.totalorder %s649_s28, %s649_s28 }
 0x4c6   :  { %p830_p2 = scmp.ne.s32.totalorder %s649_s28, %s829_s11  ;;  %p835_p4 = scmp.lt.s32.totalorder %s829_s11, %s829_s11 }
 0x4c8   :  { %579 = vrot.lane.b32.xlu1 %v959_v21, %s863_s29  ;;  %p836_p5 = por %p835_p4, %p834_p3 }
 0x4ca   :  { %p837_p6 = pnand %p836_p5, %p830_p2 }
 0x4cc   :  { %636 = vperm.xlu1 %771, %v1009_v63  }
 0x519   :  { %v525_v39 = vpop.permute.xlu0 %524 }
 0x51a   :  { %v530_v40 = vsel %vm156_vm3, %v525_v39, 0 }
 0x51b   :  { %744 = vmatpush3.bf16.msra.mxu1 %v530_v40 }
 0x51d   :  { %v578_v51 = vpop.permute.xlu0 %577 }
 0x52e   :  { %v632_v63 = vpop.permute.xlu0 %631 }
 0x53c   :  { %v465_v16 = vpop.xlane.xlu1 %464 }
 0x53d   :  { %v467_v41 = vadd.f32 1e-09, %v465_v16 }
 0x53f   :  { %781 = vrcp.f32 %v467_v41 }
 0x540   :  { %v462_v42 = vpop.xlane.xlu1 %461 }
 0x541   :  { %v466_v43 = vadd.f32 1e-09, %v462_v42 }
 0x543   :  { %783 = vrcp.f32 %v466_v43 }
 0x544   :  { %v476_v44 = vpop.permute.xlu1 %475 }
 0x545   :  { %v481_v45 = vsel %vm156_vm3, %v476_v44, 0 }
 0x546   :  { %738 = vmatpush3.bf16.msra.mxu0 %v481_v45 }
 0x547   :  { %749 = vmatprep.subr.bf16.mxu0 %v861_v4 }
 0x548   :  { %v580_v52 = vpop.permute.xlu1 %579 }
 0x549   :  { %v782_v46 = vpop.eup %781 }
 0x54a   :  { %v471_v47 = vmul.f32 %v782_v46, %v778_v31 }
 0x54c   :  { %v473_v48 = vpack.c.bf16 %v471_v47, %v471_v47  ;;  %v637_v9 = vpop.permute.xlu1 %636 }
 0x54d   :  { %v784_v21 = vpop.eup %783 }
 0x54e   :  { %v470_v49 = vmul.f32 %v784_v21, %v780_v33  ;;  %746 = vmatmul.mubr.msk.bf16.vlgmr.msra.gmra.mrb[12].mxu1 %vm152_vm4, %v473_v48 }
 0x550   :  { %v472_v50 = vpack.c.bf16 %v470_v49, %v470_v49 }
 0x552   :  { %740 = vmatmul.mubr.msk.bf16.vlgmr.msra.gmra.mrb[12].mxu0 %vm152_vm4, %v472_v50 }
 0x553   :  { %750 = vmatpush3.bf16.msra.mxu0 %v578_v51  ;;  %753 = vmatprep.mubr.msk.bf16.mxu0 %vm862_vm2, %v861_v4 }
 0x554   :  { %751 = vmatprep.subr.bf16.mxu0 %v861_v4  ;;  %v575_v4 = vsub.s32 3, %v964_v23 }
 0x556   :  { %v576_v1 = vrot.slane %v969_v24, %v575_v4 }
 0x557   :  { %752 = vmatpush3.bf16.msra.mxu0 %v580_v52 }
 0x621   :  { %v566_v54 = vpop.f32.mrb[12].mxu1 }
 0x622   :  { %v747_v55 = vpop.f32.mrb[13].mxu1 }
 0x623   :  { %v569_v56 = vpop.f32.mrb[14].mxu1 }
 0x624   :  { %v748_v57 = vpop.f32.mrb[15].mxu1 }
 0x625   :  { %v517_v58 = vpop.f32.mrb[12].mxu0 }
 0x626   :  { %v572_v59 = vpack.c.bf16 %v566_v54, %v517_v58  ;;  %v741_v60 = vpop.f32.mrb[13].mxu0 }
 0x627   :  { %v520_v61 = vpop.f32.mrb[14].mxu0 }
 0x628   :  { %v742_v62 = vpop.f32.mrb[15].mxu0  ;;  %754 = vmatmul.mubr.msk.bf16.vlgmr.msra.gmra.mrb[16].mxu0 %vm262_vm5, %v572_v59 }
 0x6fb   :  { %v620_v2 = vpop.f32.mrb[16].mxu0 }
 0x6fc   :  { %v621_v3 = vadd.f32 %v620_v2, %v576_v1  ;;  %v755_v0 = vpop.f32.mrb[17].mxu0 }
 0x6fd   :  { %v623_v5 = vpop.f32.mrb[18].mxu0 }
 0x6fe   :  { %v624_v6 = vadd.f32 %v623_v5, %v576_v1  ;;  %v756_v7 = vpop.f32.mrb[19].mxu0  ;;  %v627_v8 = vadd.f32 %v621_v3, %v146_v34 }
 0x700   :  { %v639_v10 = vmul.f32 %v632_v63, %v627_v8  ;;  %v628_v11 = vadd.f32 %v624_v6, %v148_v38 }
 0x702   :  { %641 = vst.msk [vmem:[#allocation7] sm:$0xff] %vm262_vm5, %v639_v10  ;;  %v640_v23 = vmul.f32 %v637_v9, %v628_v11 }
 0x704   :  { %642 = vst.msk [vmem:[#allocation7 + $0x8] sm:$0xff] %vm262_vm5, %v640_v23 }
 0x705   :  { %840 = shalt.err (!%p837_p6)
}
 0x706   :  { %s841_s14 = scalar_lea.hbm %s1068_s5, 256 }
 0x707   :  { %p842_p7 = scmp.ne.s32.totalorder %s1068_s5, %s841_s14  ;;  %p845_p8 = scmp.lt.u32.totalorder %s841_s14, %s1068_s5 }
 0x709   :  { %p847_p9 = pnand %p845_p8, %p842_p7 }
 0x70b   :  { %850 = shalt.err (!%p847_p9)
}
 0x70c   :  { %s867_s18 = smov 128   ;;  %s868_s19 = smov 8  }
 0x70d   :  { %654 = dma.vmem_to_hbm [thread:$0]  %s649_s28, 256, %s1068_s5, [#allocation4], %s867_s18, %s867_s18, %s868_s19  }
 0x70e   :  { %855 = dma.done.wait [#allocation4], 256  }
 0x70f   :  { %856 = vsyncadd [#allocation4], 4294967040 }
 0x710   :  { %658 = vsyncpa [#allocation3], 1 }
 0x711   :  { %659 = vsyncpa [#allocation6], 1 }
 0x712   :  { %660 = vsyncpa [#allocation4], 1 }

</bundles_post_ra>
